<compile_context>
chip_gen: v7x
topology: tpu7x:2x2x1
jax: 0.10.0
libtpu: 0.0.40
codegen_flags: <defaults>
</compile_context>

<pallas_src>
import math
import functools
from typing import NamedTuple

import jax
import jax.numpy as jnp
from jax.experimental import pallas as pl
from jax.experimental.pallas import tpu as pltpu

LANE = 128
_SQRT_HALF = 1.0 / math.sqrt(2.0)


def _round_up(x, m):
    return (x + m - 1) // m * m


def _vmem_capacity_bytes():
    """Generation-aware VMEM capacity (128 MiB v5e/v6e, 64 MiB v7x per core)."""
    try:
        info = pltpu.get_tpu_info()
        cap = int(getattr(info, "vmem_capacity_bytes", 0))
        if cap > 0:
            return cap
    except Exception:
        pass
    return 64 << 20  # conservative fallback


def _pad2d(a, rows, cols):
    pr = rows - a.shape[0]
    pc = cols - a.shape[1]
    if pr == 0 and pc == 0:
        return a
    return jnp.pad(a, ((0, pr), (0, pc)))


def _weight_spec(shape, index_map, buffers):
    """BlockSpec for streamed weights; deeper buffering when requested."""
    if buffers is None or buffers <= 2:
        return pl.BlockSpec(shape, index_map)
    try:
        return pl.BlockSpec(shape, index_map, pipeline_mode=pl.Buffered(buffers))
    except Exception:
        return pl.BlockSpec(shape, index_map)


def _gelu(h, approximate):
    if approximate:
        # tanh GELU -> EUP slot (recommended for v6e/v7x bf16 inference).
        return jax.nn.gelu(h, approximate=True)
    # exact GELU, matches nn.GELU default: 0.5*x*(1+erf(x/sqrt(2)))
    return 0.5 * h * (1.0 + jax.lax.erf(h * _SQRT_HALF))


# --------------------------------------------------------------------------- #
# Kernels
# --------------------------------------------------------------------------- #
def _mlp_resident_kernel(x_ref, w1_ref, b1_ref, w2_ref, b2_ref, o_ref, *,
                         approximate):
    # Full W1/W2 resident in VMEM; grid = (M tiles,).  fc1 -> GELU -> fc2.
    h = jnp.dot(x_ref[...], w1_ref[...],
                preferred_element_type=jnp.float32) + b1_ref[...]
    h = _gelu(h, approximate)
    # dropout (p=0.0 / eval) is identity — nothing to do.
    out = jnp.dot(h.astype(w2_ref.dtype), w2_ref[...],
                  preferred_element_type=jnp.float32)
    o_ref[...] = (out + b2_ref[...]).astype(o_ref.dtype)


def _mlp_stream_kernel(x_ref, w1_ref, b1_ref, w2_ref, b2_ref, o_ref, acc_ref, *,
                       approximate):
    # grid = (M tiles, hidden tiles); hidden axis is the reduction axis.
    k = pl.program_id(1)

    @pl.when(k == 0)
    def _init():
        acc_ref[...] = jnp.zeros_like(acc_ref)

    h = jnp.dot(x_ref[...], w1_ref[...],
                preferred_element_type=jnp.float32) + b1_ref[...]
    h = _gelu(h, approximate)
    acc_ref[...] += jnp.dot(h.astype(w2_ref.dtype), w2_ref[...],
                            preferred_element_type=jnp.float32)

    @pl.when(k == pl.num_programs(1) - 1)
    def _finalize():
        o_ref[...] = (acc_ref[...] + b2_ref[...]).astype(o_ref.dtype)


# --------------------------------------------------------------------------- #
# Planning / parameter preparation (done once per parameter set)
# --------------------------------------------------------------------------- #
class MlpPlan(NamedTuple):
    c_in: int
    c_hidden: int
    c_out: int
    c_in_p: int
    c_hid_p: int
    c_out_p: int
    th_t: int            # hidden tile (== c_hid_p when resident)
    resident: bool
    tm: int               # requested token-tile cap
    weight_buffers: int
    compute_dtype: str
    vmem_budget: int
    vmem_cap: int


def plan_mlp(in_features, hidden_features, out_features,
             compute_dtype=jnp.bfloat16, *, tm=512, th=1024, weight_buffers=2,
             vmem_budget=None, force_stream=False):
    """Static plan: lane-dense padded dims, weight-residency decision, tiles."""
    dt = jnp.dtype(compute_dtype)
    itemsize = dt.itemsize

    vmem_cap = _vmem_capacity_bytes()
    if vmem_budget is None:
        vmem_budget = (vmem_cap * 3) // 4       # headroom for compiler scratch
    vmem_budget = int(vmem_budget)

    c_in_p = _round_up(in_features, LANE)
    c_hid_p = _round_up(hidden_features, LANE)
    c_out_p = _round_up(out_features, LANE)

    # Weight residency: full W1/W2 stay in VMEM (conservatively counted as
    # double-buffered) when they use at most ~2/3 of the budget; the remainder
    # is for the double-buffered x/out tiles and the f32 hidden intermediate.
    weight_bytes = (c_in_p * c_hid_p + c_hid_p * c_out_p) * itemsize
    bias_bytes = 2 * 8 * (c_hid_p + c_out_p) * 4
    resident = (not force_stream) and (
        2 * weight_bytes + bias_bytes <= (2 * vmem_budget) // 3)

    if resident:
        th_t = c_hid_p
    else:
        # Streamed weights: on 128 MiB parts (v5e/v6e) push the token tile to
        # 1024 so arithmetic intensity sits past the roofline knee.
        if vmem_cap >= (100 << 20):
            tm = max(tm, 1024)
        th_t = max(LANE, min(_round_up(th, LANE), c_hid_p))
        nbuf = max(weight_buffers, 2)
        while (th_t > LANE and
               nbuf * (c_in_p * th_t + th_t * c_out_p) * itemsize > vmem_budget // 2):
            th_t -= LANE
        c_hid_p = _round_up(c_hid_p, th_t)   # exact: extra rows/cols are zeros

    return MlpPlan(int(in_features), int(hidden_features), int(out_features),
                   int(c_in_p), int(c_hid_p), int(c_out_p), int(th_t),
                   bool(resident), int(tm), int(weight_buffers), dt.name,
                   int(vmem_budget), int(vmem_cap))


def prepare_mlp_params(w1, b1, w2, b2, plan):
    """Cast + zero-pad parameters ONCE (outside the per-call path).

    Weights stored [in, out] (transposed nn.Linear). Zero padding is exact:
    GELU(0)=0 and zero weight rows/cols contribute nothing.
    """
    dt = jnp.dtype(plan.compute_dtype)
    w1p = _pad2d(jnp.asarray(w1, dt), plan.c_in_p, plan.c_hid_p)
    b1p = _pad2d(jnp.asarray(b1, jnp.float32).reshape(1, -1), 1, plan.c_hid_p)
    w2p = _pad2d(jnp.asarray(w2, dt), plan.c_hid_p, plan.c_out_p)
    b2p = _pad2d(jnp.asarray(b2, jnp.float32).reshape(1, -1), 1, plan.c_out_p)
    return w1p, b1p, w2p, b2p


# --------------------------------------------------------------------------- #
# Apply
# --------------------------------------------------------------------------- #
@functools.partial(jax.jit, static_argnames=("plan", "approximate"))
def mlp_pallas_apply(x, w1p, b1p, w2p, b2p, *, plan, approximate=False):
    """x: (..., C_in) -> (..., C_out) using the prepared (padded/cast) params."""
    assert x.shape[-1] == plan.c_in, "last dim of x must equal in_features"
    dt = jnp.dtype(plan.compute_dtype)
    itemsize = dt.itemsize
    out_dtype = x.dtype
    out_itemsize = jnp.dtype(out_dtype).itemsize

    orig_shape = x.shape
    x2d = x.reshape(-1, orig_shape[-1])
    if x2d.dtype != dt:
        x2d = x2d.astype(dt)
    m = x2d.shape[0]

    # ---- token tile ---------------------------------------------------------
    sub = 16 if dt == jnp.dtype(jnp.bfloat16) else 8
    tm_t = min(_round_up(plan.tm, sub), _round_up(m, sub))
    # v7x megacore: prefer >= 2 i-tiles so the parallel M axis uses both cores.
    if m >= 2 * sub and tm_t >= _round_up(m, sub):
        tm_t = _round_up((m + 1) // 2, sub)

    # ---- VMEM estimate (conservative) and retile if over budget -------------
    def vmem_estimate(tm_):
        act = (2 * tm_ * plan.c_in_p * itemsize          # x tile (double-buffered)
               + 2 * tm_ * plan.c_out_p * out_itemsize   # out tile
               + tm_ * plan.c_out_p * 4)                 # f32 result / accumulator
        if plan.resident:
            wgt = 2 * (plan.c_in_p * plan.c_hid_p
                       + plan.c_hid_p * plan.c_out_p) * itemsize
            hid = tm_ * plan.c_hid_p * (4 + itemsize)    # f32 h + cast for fc2
        else:
            nbuf = max(plan.weight_buffers, 2)
            wgt = nbuf * (plan.c_in_p * plan.th_t
                          + plan.th_t * plan.c_out_p) * itemsize
            hid = tm_ * plan.th_t * (4 + itemsize)
        bias = 2 * 8 * (plan.c_hid_p + plan.c_out_p) * 4
        return act + wgt + hid + bias

    while tm_t > sub and vmem_estimate(tm_t) > plan.vmem_budget:
        tm_t = max(sub, _round_up(tm_t // 2, sub))

    m_p = _round_up(m, tm_t)
    ni = m_p // tm_t

    # ---- pad tokens/features only when needed (exact) -----------------------
    if m_p != m or plan.c_in_p != plan.c_in:
        x2d = jnp.pad(x2d, ((0, m_p - m), (0, plan.c_in_p - plan.c_in)))

    vmem_limit = int(min(max(vmem_estimate(tm_t) + (8 << 20), 32 << 20),
                         plan.vmem_cap))

    weight_bytes = (plan.c_in_p * plan.c_hid_p
                    + plan.c_hid_p * plan.c_out_p) * itemsize
    cost = pl.CostEstimate(
        flops=2 * m_p * (plan.c_in_p * plan.c_hid_p
                         + plan.c_hid_p * plan.c_out_p),
        transcendentals=(m_p * plan.c_hid_p) if approximate else 0,
        bytes_accessed=(m_p * plan.c_in_p * itemsize
                        + (weight_bytes if plan.resident else ni * weight_bytes)
                        + m_p * plan.c_out_p * out_itemsize
                        + 8 * (plan.c_hid_p + plan.c_out_p) * 4),
    )

    if plan.resident:
        # Weights DMA'd once and revisited for every token tile.
        grid = (ni,)
        in_specs = [
            pl.BlockSpec((tm_t, plan.c_in_p), lambda i: (i, 0)),
            pl.BlockSpec((plan.c_in_p, plan.c_hid_p), lambda i: (0, 0)),
            pl.BlockSpec((1, plan.c_hid_p), lambda i: (0, 0)),
            pl.BlockSpec((plan.c_hid_p, plan.c_out_p), lambda i: (0, 0)),
            pl.BlockSpec((1, plan.c_out_p), lambda i: (0, 0)),
        ]
        out_specs = pl.BlockSpec((tm_t, plan.c_out_p), lambda i: (i, 0))
        scratch_shapes = []
        kernel = functools.partial(_mlp_resident_kernel, approximate=approximate)
        dims = ("parallel",)
    else:
        nk = plan.c_hid_p // plan.th_t
        grid = (ni, nk)
        in_specs = [
            pl.BlockSpec((tm_t, plan.c_in_p), lambda i, k: (i, 0)),
            _weight_spec((plan.c_in_p, plan.th_t), lambda i, k: (0, k),
                         plan.weight_buffers),
            pl.BlockSpec((1, plan.th_t), lambda i, k: (0, k)),
            _weight_spec((plan.th_t, plan.c_out_p), lambda i, k: (k, 0),
                         plan.weight_buffers),
            pl.BlockSpec((1, plan.c_out_p), lambda i, k: (0, 0)),
        ]
        out_specs = pl.BlockSpec((tm_t, plan.c_out_p), lambda i, k: (i, 0))
        scratch_shapes = [pltpu.VMEM((tm_t, plan.c_out_p), jnp.float32)]
        kernel = functools.partial(_mlp_stream_kernel, approximate=approximate)
        dims = ("parallel", "arbitrary")

    out_p = pl.pallas_call(
        kernel,
        out_shape=jax.ShapeDtypeStruct((m_p, plan.c_out_p), out_dtype),
        grid_spec=pltpu.PrefetchScalarGridSpec(
            num_scalar_prefetch=0,
            grid=grid,
            in_specs=in_specs,
            out_specs=out_specs,
            scratch_shapes=scratch_shapes,
        ),
        compiler_params=pltpu.CompilerParams(
            dimension_semantics=dims,
            vmem_limit_bytes=vmem_limit,
        ),
        cost_estimate=cost,
    )(x2d, w1p, b1p, w2p, b2p)

    if m_p != m or plan.c_out_p != plan.c_out:
        out_p = out_p[:m, :plan.c_out]
    return out_p.reshape(*orig_shape[:-1], plan.c_out)


def mlp_pallas(x, w1, b1, w2, b2, *, tm=512, th=1024, approximate=False,
               compute_dtype=None, weight_buffers=2, force_stream=False,
               vmem_budget=None):
    """One-shot Mlp forward: fc1 -> GELU -> (dropout p=0) -> fc2 -> (dropout).

    For repeated calls with the same parameters, build the plan with
    `plan_mlp`, pad/cast the weights once with `prepare_mlp_params`, and call
    `mlp_pallas_apply` directly (avoids re-padding/casting every call).
    Pass bf16 x (or compute_dtype=jnp.bfloat16) + approximate=True for the
    high-throughput inference path; approximate=False matches nn.GELU exactly.
    """
    compute_dtype = compute_dtype if compute_dtype is not None else x.dtype
    plan = plan_mlp(w1.shape[0], w1.shape[1], w2.shape[1], compute_dtype,
                    tm=tm, th=th, weight_buffers=weight_buffers,
                    vmem_budget=vmem_budget, force_stream=force_stream)
    params = prepare_mlp_params(w1, b1, w2, b2, plan)
    return mlp_pallas_apply(x, *params, plan=plan, approximate=approximate)


# --------------------------------------------------------------------------- #
# Reference + test
# --------------------------------------------------------------------------- #
def _reference_mlp(x, w1, b1, w2, b2, approximate=False):
    h = x @ w1 + b1
    if approximate:
        h = jax.nn.gelu(h, approximate=True)
    else:
        h = 0.5 * h * (1.0 + jax.lax.erf(h / math.sqrt(2.0)))
    return h @ w2 + b2


if __name__ == "__main__":
    key = jax.random.PRNGKey(0)
    k_x, k_w1, k_b1, k_w2, k_b2 = jax.random.split(key, 5)

    batch, seq = 2, 8
    in_features, hidden_features, out_features = 16, 32, 16

    x = jax.random.normal(k_x, (batch, seq, in_features), dtype=jnp.float32)

    # Deterministic parameters (same shapes as nn.Linear, stored as [in, out]).
    w1 = jax.random.normal(k_w1, (in_features, hidden_features), jnp.float32) * 0.1
    b1 = jax.random.normal(k_b1, (hidden_features,), jnp.float32) * 0.1
    w2 = jax.random.normal(k_w2, (hidden_features, out_features), jnp.float32) * 0.1
    b2 = jax.random.normal(k_b2, (out_features,), jnp.float32) * 0.1

    ref_exact = _reference_mlp(x, w1, b1, w2, b2, approximate=False)
    ref_tanh = _reference_mlp(x, w1, b1, w2, b2, approximate=True)

    # 1) f32, exact erf GELU (matches nn.GELU), weight-resident path.
    out = jax.block_until_ready(mlp_pallas(x, w1, b1, w2, b2, approximate=False))
    assert out.shape == (batch, seq, out_features)
    assert jnp.allclose(out, ref_exact, atol=1e-4, rtol=1e-4)

    # 2) Recommended inference path: bf16 MXU + tanh GELU (EUP), weights
    #    prepared once and reused across calls.
    plan_bf16 = plan_mlp(in_features, hidden_features, out_features, jnp.bfloat16)
    params_bf16 = prepare_mlp_params(w1, b1, w2, b2, plan_bf16)
    xb = x.astype(jnp.bfloat16)
    out_b = jax.block_until_ready(
        mlp_pallas_apply(xb, *params_bf16, plan=plan_bf16, approximate=True))
    assert out_b.shape == (batch, seq, out_features)
    assert jnp.allclose(out_b.astype(jnp.float32), ref_tanh, atol=5e-2, rtol=5e-2)
    # second call re-uses the already padded/cast parameters (no re-prepare)
    jax.block_until_ready(
        mlp_pallas_apply(xb, *params_bf16, plan=plan_bf16, approximate=True))

    # 3) Streamed-weight fallback (hidden axis tiled + f32 accumulator),
    #    exercised by forcing streaming with a small hidden tile.
    hidden_big = 256
    w1b = jax.random.normal(k_w1, (in_features, hidden_big), jnp.float32) * 0.1
    b1b = jax.random.normal(k_b1, (hidden_big,), jnp.float32) * 0.1
    w2b = jax.random.normal(k_w2, (hidden_big, out_features), jnp.float32) * 0.1
    ref_s = _reference_mlp(x, w1b, b1b, w2b, b2, approximate=False)
    out_s = jax.block_until_ready(
        mlp_pallas(x, w1b, b1b, w2b, b2, approximate=False,
                   th=128, force_stream=True))
    assert out_s.shape == (batch, seq, out_features)
    assert jnp.allclose(out_s, ref_s, atol=1e-3, rtol=1e-3)

    print("KERNEL_OK")
</pallas_src>

<mosaic_0001>
module attributes {stable_mosaic.version = 11 : i64} {
  func.func @_mlp_resident_kernel(%arg0: i32, %arg1: memref<8x128xf32, #tpu.memory_space<vmem>>, %arg2: memref<128x128xf32, #tpu.memory_space<vmem>>, %arg3: memref<1x128xf32, #tpu.memory_space<vmem>>, %arg4: memref<128x128xf32, #tpu.memory_space<vmem>>, %arg5: memref<1x128xf32, #tpu.memory_space<vmem>>, %arg6: memref<8x128xf32, #tpu.memory_space<vmem>>) attributes {dimension_semantics = [#tpu.dimension_semantics<parallel>], iteration_bounds = array<i64: 2>, scalar_prefetch = 0 : i64, scratch_operands = 0 : i64, tpu.core_type = #tpu.core_type<tc>, window_params = [{transform_indices = @transform_0, window_bounds = array<i64: 8, 128>}, {pipeline_mode = #tpu.pipeline_mode<synchronous>, transform_indices = @transform_1, window_bounds = array<i64: 128, 128>}, {pipeline_mode = #tpu.pipeline_mode<synchronous>, transform_indices = @transform_2, window_bounds = array<i64: 1, 128>}, {pipeline_mode = #tpu.pipeline_mode<synchronous>, transform_indices = @transform_3, window_bounds = array<i64: 128, 128>}, {pipeline_mode = #tpu.pipeline_mode<synchronous>, transform_indices = @transform_4, window_bounds = array<i64: 1, 128>}, {transform_indices = @transform_5, window_bounds = array<i64: 8, 128>}]} {
    %c0 = arith.constant 0 : index
    %c0_0 = arith.constant 0 : index
    %0 = vector.load %arg1[%c0, %c0_0] : memref<8x128xf32, #tpu.memory_space<vmem>>, vector<8x128xf32>
    %c0_1 = arith.constant 0 : index
    %c0_2 = arith.constant 0 : index
    %1 = vector.load %arg2[%c0_1, %c0_2] : memref<128x128xf32, #tpu.memory_space<vmem>>, vector<128x128xf32>
    %cst = arith.constant dense<0.000000e+00> : vector<8x128xf32>
    %2 = tpu.matmul %0, %1, %cst {dimension_numbers = #tpu.dot_dimension_numbers<[1], [0], [0], [1], [0, 0, 1, 1], [], []>} : vector<8x128xf32>, vector<128x128xf32>, vector<8x128xf32> -> vector<8x128xf32>
    %c0_3 = arith.constant 0 : index
    %c0_4 = arith.constant 0 : index
    %3 = vector.load %arg3[%c0_3, %c0_4] : memref<1x128xf32, #tpu.memory_space<vmem>>, vector<1x128xf32>
    %4 = vector.broadcast %3 : vector<1x128xf32> to vector<8x128xf32>
    %5 = arith.addf %2, %4 : vector<8x128xf32>
    %cst_5 = arith.constant 5.000000e-01 : f32
    %6 = vector.broadcast %cst_5 : f32 to vector<8x128xf32>
    %7 = arith.mulf %6, %5 : vector<8x128xf32>
    %cst_6 = arith.constant 0.707106769 : f32
    %8 = vector.broadcast %cst_6 : f32 to vector<8x128xf32>
    %9 = arith.mulf %5, %8 : vector<8x128xf32>
    %10 = math.erf %9 : vector<8x128xf32>
    %cst_7 = arith.constant 1.000000e+00 : f32
    %11 = vector.broadcast %cst_7 : f32 to vector<8x128xf32>
    %12 = arith.addf %11, %10 : vector<8x128xf32>
    %13 = arith.mulf %7, %12 : vector<8x128xf32>
    %c0_8 = arith.constant 0 : index
    %c0_9 = arith.constant 0 : index
    %14 = vector.load %arg4[%c0_8, %c0_9] : memref<128x128xf32, #tpu.memory_space<vmem>>, vector<128x128xf32>
    %cst_10 = arith.constant dense<0.000000e+00> : vector<8x128xf32>
    %15 = tpu.matmul %13, %14, %cst_10 {dimension_numbers = #tpu.dot_dimension_numbers<[1], [0], [0], [1], [0, 0, 1, 1], [], []>} : vector<8x128xf32>, vector<128x128xf32>, vector<8x128xf32> -> vector<8x128xf32>
    %c0_11 = arith.constant 0 : index
    %c0_12 = arith.constant 0 : index
    %16 = vector.load %arg5[%c0_11, %c0_12] : memref<1x128xf32, #tpu.memory_space<vmem>>, vector<1x128xf32>
    %17 = vector.broadcast %16 : vector<1x128xf32> to vector<8x128xf32>
    %18 = arith.addf %15, %17 : vector<8x128xf32>
    %c0_13 = arith.constant 0 : index
    %c0_14 = arith.constant 0 : index
    %19 = vector.load %arg6[%c0_13, %c0_14] : memref<8x128xf32, #tpu.memory_space<vmem>>, vector<8x128xf32>
    tpu.vector_store %arg6[%c0_13, %c0_14], %18 {strides = array<i32>} : memref<8x128xf32, #tpu.memory_space<vmem>>, vector<8x128xf32>,
    return
  }
  func.func @transform_0(%arg0: i32) -> (i32, i32) {
    %c0_i32 = arith.constant 0 : i32
    %c0_i32_0 = arith.constant 0 : i32
    return %arg0, %c0_i32 : i32, i32
  }
  func.func @transform_1(%arg0: i32) -> (i32, i32) {
    %c0_i32 = arith.constant 0 : i32
    %c0_i32_0 = arith.constant 0 : i32
    %c0_i32_1 = arith.constant 0 : i32
    return %c0_i32, %c0_i32_0 : i32, i32
  }
  func.func @transform_2(%arg0: i32) -> (i32, i32) {
    %c0_i32 = arith.constant 0 : i32
    %c0_i32_0 = arith.constant 0 : i32
    %c0_i32_1 = arith.constant 0 : i32
    return %c0_i32, %c0_i32_0 : i32, i32
  }
  func.func @transform_3(%arg0: i32) -> (i32, i32) {
    %c0_i32 = arith.constant 0 : i32
    %c0_i32_0 = arith.constant 0 : i32
    %c0_i32_1 = arith.constant 0 : i32
    return %c0_i32, %c0_i32_0 : i32, i32
  }
  func.func @transform_4(%arg0: i32) -> (i32, i32) {
    %c0_i32 = arith.constant 0 : i32
    %c0_i32_0 = arith.constant 0 : i32
    %c0_i32_1 = arith.constant 0 : i32
    return %c0_i32, %c0_i32_0 : i32, i32
  }
  func.func @transform_5(%arg0: i32) -> (i32, i32) {
    %c0_i32 = arith.constant 0 : i32
    %c0_i32_0 = arith.constant 0 : i32
    return %arg0, %c0_i32 : i32, i32
  }
}

</mosaic_0001>

<bundles_post_ra>
// kernel: mlp_pallas_apply.1
= control target key start
LH: loop header
LB: loop body
LE: loop exit
PB: predicated region body
PF: predicated region fallthrough
CT: control target
= control target key end

     0   :  { %10 = vsyncpa [#allocation3], 0  ;;  %s952_s0 = inlined_call_operand.vmem [shape: f32[16,128], index: 0, kind: input, shape index: {}]   ;;  %s953_s1 = inlined_call_operand.hbm [shape: f32[128,128], index: 1, kind: input, shape index: {}]   ;;  %s954_s2 = inlined_call_operand.vmem [shape: f32[1,128], index: 2, kind: input, shape index: {}]   ;;  %s955_s3 = inlined_call_operand.hbm [shape: f32[128,128], index: 3, kind: input, shape index: {}]   ;;  %s956_s4 = inlined_call_operand.vmem [shape: f32[1,128], index: 4, kind: input, shape index: {}]   ;;  %s957_s5 = inlined_call_operand.vmem [shape: f32[16,128], index: 5, kind: output, shape index: {}]  }
   0x1   :  { %11 = vsyncpa [#allocation5], 0  ;;  %s830_s18 = smov 0  }
   0x2 LB: > { %s836_s19 = sadd.s32 4294967295, %s791_s18   ;;  %p520_p0 = scmp.ge.s32.totalorder %s791_s18, 1  ;;  %s791_s18 = sphi %s830_s18, %s17_s18  }
   0x3   : > { %p158_p1 = scmp.lt.s32.totalorder %s791_s18, 3  ;;  %s793_s20 = smov [#allocation2]  }
   0x4   : > { %s170_s21 = sshll.u32 %s793_s20, 4  ;;  %p958_p3 = scmp.eq.s32.totalorder %s836_s19, 0  ;;  %s171_s21 = int_to_ptr.vmem [resolvable:$true] %s170_s21 }
   0x5   : > { %p840_p2 = pnand %p520_p0, %p158_p1  ;;  %s794_s23 = smov [#allocation4]  }
   0x6   : > { %s186_s24 = sshll.u32 %s794_s23, 4  ;;  %s721_s28 = scalar_lea.hbm %s953_s1, 2048  ;;  %s853_s24 = int_to_ptr.vmem [resolvable:$true] %s186_s24 }
   0x7   : > { %s960_s22 = scalar_select %p840_p2, 1, 0 }
   0x8   : > { %p693_p4 = pneg %p840_p2  ;;  %p722_p6 = scmp.ne.s32.totalorder %s953_s1, %s721_s28 }
   0x9   : > { %p728_p10 = scmp.lt.u32.totalorder %s721_s28, %s953_s1 }
   0xa   : > { %p849_p5 = pnand %p958_p3, %p693_p4 }
   0xc   : > { %p723_p7 = pneg %p849_p5 }
   0xe   : > { %p724_p8 = pnand %p723_p7, %p722_p6 }
  0x10   : > { %p725_p9 = pneg %p724_p8 }
  0x12   : > { %p730_p11 = pnand %p728_p10, %p725_p9 }
  0x14   : > { %733 = shalt.err (!%p730_p11)
}
  0x15   : > { %s734_s8 = scalar_lea.vmem %s171_s21, 2048  ;;  %p742_p1 = scmp.lt.s32.totalorder %s171_s21, %s171_s21 }
  0x16   : > { %p735_p12 = scmp.ne.s32.totalorder %s171_s21, %s734_s8  ;;  %p743_p4 = scmp.lt.s32.totalorder %s734_s8, %s734_s8 }
  0x18   : > { %p737_p13 = pnand %p735_p12, %p723_p7  ;;  %p744_p3 = por %p743_p4, %p742_p1 }
  0x1a   : > { %p738_p0 = pneg %p737_p13 }
  0x1c   : > { %p745_p2 = pnand %p744_p3, %p738_p0 }
  0x1e   : > { %748 = shalt.err (!%p745_p2)
}
  0x1f   : > { %s795_s9 = smov 128   ;;  %s796_s10 = smov 8  }
  0x20   : > { %696 = dma.hbm_to_vmem [thread:$0]  (!%p849_p5), %s953_s1, 2048, %s171_s21, [#allocation3], %s795_s9, %s795_s9, %s796_s10  }
  0x21   : > { %s749_s15 = scalar_lea.hbm %s955_s3, 2048 }
  0x22   : > { %p750_p6 = scmp.ne.s32.totalorder %s955_s3, %s749_s15  ;;  %p756_p8 = scmp.lt.u32.totalorder %s749_s15, %s955_s3 }
  0x24   : > { %p752_p2 = pnand %p750_p6, %p723_p7 }
  0x26   : > { %p753_p3 = pneg %p752_p2 }
  0x28   : > { %p758_p9 = pnand %p756_p8, %p753_p3 }
  0x2a   : > { %761 = shalt.err (!%p758_p9)
}
  0x2b   : > { %s762_s21 = scalar_lea.vmem %s853_s24, 2048  ;;  %p770_p13 = scmp.lt.s32.totalorder %s853_s24, %s853_s24 }
  0x2c   : > { %p763_p10 = scmp.ne.s32.totalorder %s853_s24, %s762_s21  ;;  %p771_p0 = scmp.lt.s32.totalorder %s762_s21, %s762_s21 }
  0x2e   : > { %p765_p11 = pnand %p763_p10, %p723_p7  ;;  %p772_p1 = por %p771_p0, %p770_p13 }
  0x30   : > { %p766_p12 = pneg %p765_p11 }
  0x32   : > { %p773_p4 = pnand %p772_p1, %p766_p12 }
  0x34   : > { %776 = shalt.err (!%p773_p4)
}
  0x35   : > { %699 = dma.hbm_to_vmem [thread:$0]  (!%p849_p5), %s955_s3, 2048, %s853_s24, [#allocation5], %s795_s9, %s795_s9, %s796_s10  }
  0x36   : > { %p962_p6 = scmp.ne.s32.totalorder %s960_s22, 0 }
  0x37   : > { %p963_p2 = scmp.eq.s32.totalorder (!%p962_p6), %s836_s19, 0 }
  0x38   : > { %212 = sbr.rel (%p962_p6) target bundleno = 547 (0x223), region = 40 }
  0x3f   : > { %782 = dma.done.wait (%p963_p2), [#allocation3], 2048   ;;  %p964_p7 = pmov %p963_p2 }
  0x40   : > { %p965_p3 = pmov %p963_p2 }
  0x41   : > { %784 = vsyncadd (%p964_p7), [#allocation3], 4294965248 }
  0x42   : > { %786 = dma.done.wait (%p965_p3), [#allocation5], 2048   ;;  %p966_p8 = pmov %p963_p2 }
  0x43   : > { %v797_v0 = vmov 0.0|0.0   ;;  %vm798_vm0 = vmmov 0   ;;  %v799_v1 = vmov 0.0   ;;  %v251_v2 = vld [vmem:[#allocation2] sm:$0xff]  ;;  %v252_v3 = vld [vmem:[#allocation2 + $0x8] sm:$0xff]  ;;  %v253_v4 = vld [vmem:[#allocation2 + $0x10] sm:$0xff] }
  0x44   : > { %788 = vsyncadd (%p966_p8), [#allocation5], 4294965248  ;;  %637 = vmatprep.subr.bf16.mxu0 %v797_v0  ;;  %599 = vmatprep.mubr.msk.f32.mxu0 %vm798_vm0, %v799_v1  ;;  %v638_v5 = vpack.c.bf16 %v252_v3, %v251_v2  ;;  %v254_v6 = vld [vmem:[#allocation2 + $0x18] sm:$0xff]  ;;  %v255_v8 = vld [vmem:[#allocation2 + $0x20] sm:$0xff]  ;;  %p242_p5 = scmp.lt.s32.totalorder %s836_s19, 1 }
  0x45   : > { %661 = vmatprep.subr.bf16.mxu1 %v797_v0  ;;  %634 = vmatprep.mubr.msk.f32.mxu1 %vm798_vm0, %v799_v1  ;;  %v641_v7 = vpack.c.bf16 %v254_v6, %v253_v4  ;;  %v256_v9 = vld [vmem:[#allocation2 + $0x28] sm:$0xff]  ;;  %v349_v10 = vld [vmem:[#allocation4] sm:$0xff]  ;;  %v351_v12 = vld [vmem:[#allocation4 + $0x10] sm:$0xff] }
  0x46   : > { %639 = vmatpush3.bf16.msra.mxu0 %v638_v5  ;;  %v350_v11 = vld [vmem:[#allocation4 + $0x8] sm:$0xff]  ;;  %v352_v13 = vld [vmem:[#allocation4 + $0x18] sm:$0xff]  ;;  %v644_v14 = vpack.c.bf16 %v256_v9, %v255_v8  ;;  %v257_v16 = vld [vmem:[#allocation2 + $0x30] sm:$0xff]  ;;  %s968_s19 = smov (!%p242_p5, %s836_s19), 1 }
  0x47   : > { %640 = vmatprep.subr.bf16.mxu0 %v797_v0  ;;  %v662_v15 = vpack.c.bf16 %v350_v11, %v349_v10  ;;  %v258_v17 = vld [vmem:[#allocation2 + $0x38] sm:$0xff]  ;;  %v665_v18 = vpack.c.bf16 %v352_v13, %v351_v12  ;;  %v353_v19 = vld [vmem:[#allocation4 + $0x20] sm:$0xff]  ;;  %v354_v20 = vld [vmem:[#allocation4 + $0x28] sm:$0xff]  ;;  %s527_s22 = sshll.u32 %s968_s19, 3 }
  0x48   : > { %v647_v21 = vpack.c.bf16 %v258_v17, %v257_v16  ;;  %v259_v22 = vld [vmem:[#allocation2 + $0x40] sm:$0xff]  ;;  %v260_v23 = vld [vmem:[#allocation2 + $0x48] sm:$0xff]  ;;  %v668_v24 = vpack.c.bf16 %v354_v20, %v353_v19  ;;  %v261_v26 = vld [vmem:[#allocation2 + $0x50] sm:$0xff]  ;;  %s245_s28 = scalar_lea.vmem %s952_s0, %s527_s22  ;;  %s249_s10 = scalar_lea.vmem %s957_s5, %s527_s22 }
  0x49   : > { %663 = vmatpush3.bf16.msra.mxu1 %v662_v15  ;;  %v650_v25 = vpack.c.bf16 %v260_v23, %v259_v22  ;;  %v262_v27 = vld [vmem:[#allocation2 + $0x58] sm:$0xff]  ;;  %v263_v29 = vld [vmem:[#allocation2 + $0x60] sm:$0xff]  ;;  %v264_v30 = vld [vmem:[#allocation2 + $0x68] sm:$0xff] }
  0x4a   : > { %642 = vmatpush3.bf16.msra.mxu0 %v641_v7  ;;  %664 = vmatprep.subr.bf16.mxu1 %v797_v0  ;;  %v653_v28 = vpack.c.bf16 %v262_v27, %v261_v26  ;;  %v656_v31 = vpack.c.bf16 %v264_v30, %v263_v29  ;;  %v265_v32 = vld [vmem:[#allocation2 + $0x70] sm:$0xff]  ;;  %v266_v33 = vld [vmem:[#allocation2 + $0x78] sm:$0xff]  ;;  %v250_v35 = vld [vmem:[%s245_s28] sm:$0xff] }
  0x4b   : > { %643 = vmatprep.subr.bf16.mxu0 %v797_v0  ;;  %v659_v34 = vpack.c.bf16 %v266_v33, %v265_v32  ;;  %v355_v36 = vld [vmem:[#allocation4 + $0x30] sm:$0xff]  ;;  %v356_v37 = vld [vmem:[#allocation4 + $0x38] sm:$0xff]  ;;  %v357_v39 = vld [vmem:[#allocation4 + $0x40] sm:$0xff] }
  0x4c   : > { %v671_v38 = vpack.c.bf16 %v356_v37, %v355_v36  ;;  %v358_v40 = vld [vmem:[#allocation4 + $0x48] sm:$0xff]  ;;  %v359_v42 = vld [vmem:[#allocation4 + $0x50] sm:$0xff]  ;;  %v360_v43 = vld [vmem:[#allocation4 + $0x58] sm:$0xff] }
  0x4d   : > { %666 = vmatpush3.bf16.msra.mxu1 %v665_v18  ;;  %v674_v41 = vpack.c.bf16 %v358_v40, %v357_v39  ;;  %v677_v44 = vpack.c.bf16 %v360_v43, %v359_v42  ;;  %v361_v45 = vld [vmem:[#allocation4 + $0x60] sm:$0xff]  ;;  %v362_v46 = vld [vmem:[#allocation4 + $0x68] sm:$0xff]  ;;  %v363_v48 = vld [vmem:[#allocation4 + $0x70] sm:$0xff] }
  0x4e   : > { %645 = vmatpush3.bf16.msra.mxu0 %v644_v14  ;;  %667 = vmatprep.subr.bf16.mxu1 %v797_v0  ;;  %v680_v47 = vpack.c.bf16 %v362_v46, %v361_v45  ;;  %v364_v49 = vld [vmem:[#allocation4 + $0x78] sm:$0xff]  ;;  %v529_v51 = vld [vmem:[%s954_s2] ss:$0 sm:$0xff] }
  0x4f   : > { %646 = vmatprep.subr.bf16.mxu0 %v797_v0  ;;  %v683_v50 = vpack.c.bf16 %v364_v49, %v363_v48  ;;  %v530_v60 = vld [vmem:[%s956_s4] ss:$0 sm:$0xff] }
  0x51   : > { %669 = vmatpush3.bf16.msra.mxu1 %v668_v24 }
  0x52   : > { %648 = vmatpush3.bf16.msra.mxu0 %v647_v21  ;;  %670 = vmatprep.subr.bf16.mxu1 %v797_v0 }
  0x53   : > { %649 = vmatprep.subr.bf16.mxu0 %v797_v0 }
  0x55   : > { %672 = vmatpush3.bf16.msra.mxu1 %v671_v38 }
  0x56   : > { %651 = vmatpush3.bf16.msra.mxu0 %v650_v25  ;;  %673 = vmatprep.subr.bf16.mxu1 %v797_v0 }
  0x57   : > { %652 = vmatprep.subr.bf16.mxu0 %v797_v0 }
  0x59   : > { %675 = vmatpush3.bf16.msra.mxu1 %v674_v41 }
  0x5a   : > { %654 = vmatpush3.bf16.msra.mxu0 %v653_v28  ;;  %676 = vmatprep.subr.bf16.mxu1 %v797_v0 }
  0x5b   : > { %655 = vmatprep.subr.bf16.mxu0 %v797_v0 }
  0x5d   : > { %678 = vmatpush3.bf16.msra.mxu1 %v677_v44 }
  0x5e   : > { %657 = vmatpush3.bf16.msra.mxu0 %v656_v31  ;;  %679 = vmatprep.subr.bf16.mxu1 %v797_v0 }
  0x5f   : > { %658 = vmatprep.subr.bf16.mxu0 %v797_v0 }
  0x61   : > { %681 = vmatpush3.bf16.msra.mxu1 %v680_v47 }
  0x62   : > { %660 = vmatpush3.bf16.msra.mxu0 %v659_v34  ;;  %682 = vmatprep.subr.bf16.mxu1 %v797_v0 }
  0x65   : > { %600 = vmatmul.mubr.f32.vlgmr.msra.gmra.mrb[0].mxu0 %v250_v35  ;;  %684 = vmatpush3.bf16.msra.mxu1 %v683_v50 }
 0x138   : > { %v340_v52 = vpop.f32.mrb[0].mxu0 }
 0x139   : > { %v341_v53 = vadd.f32 %v529_v51, %v340_v52  ;;  %v601_v54 = vpop.f32.mrb[1].mxu0 }
 0x13b   : > { %v345_v55 = vmul.f32 0.70710677, %v341_v53  ;;  %v344_v57 = vmul.f32 0.5, %v341_v53 }
 0x13d   : > { %719 = verf.f32 %v345_v55 }
 0x147   : > { %v720_v56 = vpop.eup %719 }
 0x148   : > { %v347_v58 = vadd.f32 1.0, %v720_v56 }
 0x14a   : > { %v348_v59 = vmul.f32 %v347_v58, %v344_v57 }
 0x14c   : > { %635 = vmatmul.mubr.f32.vlgmr.msra.gmra.mrb[0].mxu1 %v348_v59 }
 0x21f   : > { %v438_v61 = vpop.f32.mrb[0].mxu1 }
 0x220   : > { %v439_v62 = vadd.f32 %v530_v60, %v438_v61  ;;  %v636_v63 = vpop.f32.mrb[1].mxu1 }
 0x222   : > { %442 = vst [vmem:[%s249_s10] sm:$0xff] %v439_v62 }
 0x223 PF: > { %s17_s18 = sadd.s32 1, %s791_s18  }
 0x224   : > { %p14_p9 = scmp.ge.s32.totalorder %s17_s18, 4  }
 0x226   :  { %16 = sbr.rel (!%p14_p9) target bundleno = 2 (0x2), region = 79 }
 0x22d   :  { %462 = vsyncpa [#allocation3], 1 }
 0x22e   :  { %464 = vsyncpa [#allocation3 + $0x1], 1 }
 0x22f   :  { %465 = vsyncpa [#allocation5], 1 }

</bundles_post_ra>
